<compile_context>
chip_gen: v7x
topology: tpu7x:2x2x1
jax: 0.10.0
libtpu: 0.0.40
codegen_flags: <defaults>
</compile_context>

<pallas_src>
from functools import partial

import jax
import jax.numpy as jnp
from jax.experimental import pallas as pl
from jax.experimental.pallas import tpu as pltpu


def mha_kernel(x_ref, wqkv_ref, wo_ref, bo_ref, o_ref, o_heads_ref, *,
               num_heads, head_size, n_embed):
    """One grid step = one batch row, all heads."""
    C = n_embed
    Dh = head_size
    # NOTE: the torch module scales by C**-0.5 where C = n_embed (not head_size).
    scale = C ** -0.5

    x = x_ref[0].astype(jnp.bfloat16)                                   # (T, C)
    T = x.shape[0]

    # Fused QKV projection: single bf16 MXU matmul, f32 accumulation.
    qkv = jnp.dot(x, wqkv_ref[...].astype(jnp.bfloat16),
                  preferred_element_type=jnp.float32)                   # (T, 3C)

    # q/k/v slabs, heads packed along lanes; softmax scale folded into q.
    q_all = (qkv[:, :C] * scale).astype(jnp.bfloat16)                   # (T, C)
    k_all = qkv[:, C:2 * C].astype(jnp.bfloat16)                        # (T, C)
    v_all = qkv[:, 2 * C:3 * C].astype(jnp.bfloat16)                    # (T, C)

    # Causal mask built once per grid step (shared by all heads), finite value.
    row = jax.lax.broadcasted_iota(jnp.int32, (T, T), 0)
    col = jax.lax.broadcasted_iota(jnp.int32, (T, T), 1)
    causal = row >= col

    # Per-head attention; num_heads is a Python int so this unrolls at trace time.
    for h in range(num_heads):
        lo, hi = h * Dh, (h + 1) * Dh
        q = q_all[:, lo:hi]                                             # (T, Dh)
        k = k_all[:, lo:hi]
        v = v_all[:, lo:hi]

        # Scores q @ k^T without materializing a transpose (MXU-native form).
        s = jax.lax.dot_general(q, k, (((1,), (1,)), ((), ())),
                                preferred_element_type=jnp.float32)     # (T, T)
        s = jnp.where(causal, s, jnp.float32(-1e30))

        # Numerically-stable softmax; denominator reciprocal on the EUP.
        s = s - jnp.max(s, axis=-1, keepdims=True)
        p = jnp.exp(s)
        p = p * pl.reciprocal(jnp.sum(p, axis=-1, keepdims=True), approx=True)

        o_h = jnp.dot(p.astype(jnp.bfloat16), v,
                      preferred_element_type=jnp.float32)               # (T, Dh)
        # Pack this head's output into the lane-dense (T, C) slab at offset h*Dh.
        o_heads_ref[:, lo:hi] = o_h

    # ONE output projection with K = C (MXU-friendly), bias added in f32.
    out = jnp.dot(o_heads_ref[...].astype(jnp.bfloat16),
                  wo_ref[...].astype(jnp.bfloat16),
                  preferred_element_type=jnp.float32)                   # (T, C)
    out = out + bo_ref[...].astype(jnp.float32)
    o_ref[0] = out.astype(o_ref.dtype)


def multi_head_attention(x, w_qkv, w_o, b_o, *, num_heads, head_size):
    """x: (B, T, C); w_qkv: (C, 3C) [Q|K|V, heads packed along columns];
    w_o: (C, C); b_o: (1, C)."""
    B, T, C = x.shape
    assert num_heads * head_size == C
    assert w_qkv.shape == (C, 3 * C) and w_o.shape == (C, C) and b_o.shape == (1, C)

    kernel = partial(mha_kernel, num_heads=num_heads, head_size=head_size, n_embed=C)
    return pl.pallas_call(
        kernel,
        out_shape=jax.ShapeDtypeStruct((B, T, C), x.dtype),
        grid_spec=pltpu.PrefetchScalarGridSpec(
            num_scalar_prefetch=0,
            grid=(B,),                                               # one step per batch row
            in_specs=[
                pl.BlockSpec((1, T, C), lambda b: (b, 0, 0)),        # x
                pl.BlockSpec((C, 3 * C), lambda b: (0, 0)),          # fused Wqkv
                pl.BlockSpec((C, C), lambda b: (0, 0)),              # Wo (full)
                pl.BlockSpec((1, C), lambda b: (0, 0)),              # output bias
            ],
            out_specs=pl.BlockSpec((1, T, C), lambda b: (b, 0, 0)),
            scratch_shapes=[pltpu.VMEM((T, C), jnp.float32)],        # packed head outputs
        ),
        compiler_params=pltpu.CompilerParams(
            dimension_semantics=("parallel",)),
    )(x, w_qkv, w_o, b_o)


def mha_reference(x, w_q, w_k, w_v, w_o, b_o):
    """Pure-JAX reference for correctness checking (matches the torch module)."""
    B, T, C = x.shape
    scale = C ** -0.5
    q = jnp.einsum("btc,hcd->bhtd", x, w_q)
    k = jnp.einsum("btc,hcd->bhtd", x, w_k)
    v = jnp.einsum("btc,hcd->bhtd", x, w_v)
    s = jnp.einsum("bhtd,bhsd->bhts", q, k) * scale
    mask = jnp.tril(jnp.ones((T, T), dtype=bool))
    s = jnp.where(mask, s, -jnp.inf)
    p = jax.nn.softmax(s, axis=-1)
    o = jnp.einsum("bhts,bhsd->bhtd", p, v)                  # (B, H, T, Dh)
    o = jnp.transpose(o, (0, 2, 1, 3)).reshape(B, T, C)      # concat heads
    return o @ w_o + b_o[0]


if __name__ == "__main__":
    # Hyperparameters implied by the module (small test sizes).
    n_embed = 32
    num_heads = 4
    head_size = n_embed // num_heads   # 8
    block_size = 8                     # T == block_size (tril covers full seq)
    B, T = 2, block_size
    # dropout -> identity in eval mode (omitted in kernel)

    key = jax.random.PRNGKey(0)
    kx, kq, kk, kv, kw, kb = jax.random.split(key, 6)

    # nn.Linear-style uniform init; per-head weights stored as (in, out).
    bound = 1.0 / (n_embed ** 0.5)

    def uinit(k, shape):
        return jax.random.uniform(k, shape, jnp.float32, -bound, bound)

    w_q = uinit(kq, (num_heads, n_embed, head_size))         # (H, C, Dh)
    w_k = uinit(kk, (num_heads, n_embed, head_size))
    w_v = uinit(kv, (num_heads, n_embed, head_size))
    w_o = uinit(kw, (n_embed, n_embed))                      # (in=C [head-concat], out=C)
    b_o = uinit(kb, (1, n_embed))                            # (1, C)

    x = jax.random.normal(kx, (B, T, n_embed), dtype=jnp.float32)

    # Pack heads along the lane dimension and fuse Q|K|V into one (C, 3C) slab.
    def pack(w):                                             # (H, C, Dh) -> (C, H*Dh)
        return jnp.transpose(w, (1, 0, 2)).reshape(n_embed, num_heads * head_size)

    w_qkv = jnp.concatenate([pack(w_q), pack(w_k), pack(w_v)], axis=1)   # (C, 3C)

    out = multi_head_attention(x, w_qkv, w_o, b_o,
                               num_heads=num_heads, head_size=head_size)
    out = jax.block_until_ready(out)

    ref = mha_reference(x, w_q, w_k, w_v, w_o, b_o)
    assert out.shape == (B, T, n_embed)
    max_err = float(jnp.max(jnp.abs(out - ref)))
    # bf16 matmul operands (f32 accumulation) + approx softmax reciprocal ->
    # relaxed tolerance vs. the f32 reference.
    assert jnp.allclose(out, ref, atol=3e-2, rtol=3e-2), \
        f"mismatch vs JAX reference (max abs err {max_err})"

    print("KERNEL_OK")
</pallas_src>

<mosaic_0001>
module attributes {stable_mosaic.version = 11 : i64} {
  func.func @mha_kernel(%arg0: i32, %arg1: memref<1x8x32xf32, #tpu.memory_space<vmem>>, %arg2: memref<32x96xf32, #tpu.memory_space<vmem>>, %arg3: memref<32x32xf32, #tpu.memory_space<vmem>>, %arg4: memref<1x32xf32, #tpu.memory_space<vmem>>, %arg5: memref<1x8x32xf32, #tpu.memory_space<vmem>>, %arg6: memref<8x32xf32, #tpu.memory_space<vmem>>) attributes {dimension_semantics = [#tpu.dimension_semantics<parallel>], iteration_bounds = array<i64: 2>, scalar_prefetch = 0 : i64, scratch_operands = 1 : i64, tpu.core_type = #tpu.core_type<tc>, window_params = [{transform_indices = @transform_0, window_bounds = array<i64: 1, 8, 32>}, {pipeline_mode = #tpu.pipeline_mode<synchronous>, transform_indices = @transform_1, window_bounds = array<i64: 32, 96>}, {pipeline_mode = #tpu.pipeline_mode<synchronous>, transform_indices = @transform_2, window_bounds = array<i64: 32, 32>}, {pipeline_mode = #tpu.pipeline_mode<synchronous>, transform_indices = @transform_3, window_bounds = array<i64: 1, 32>}, {transform_indices = @transform_4, window_bounds = array<i64: 1, 8, 32>}]} {
    %c0 = arith.constant 0 : index
    %c0_0 = arith.constant 0 : index
    %c0_1 = arith.constant 0 : index
    %0 = vector.load %arg1[%c0, %c0_0, %c0_1] : memref<1x8x32xf32, #tpu.memory_space<vmem>>, vector<1x8x32xf32>
    %1 = vector.shape_cast %0 : vector<1x8x32xf32> to vector<8x32xf32>
    %2 = arith.truncf %1 : vector<8x32xf32> to vector<8x32xbf16>
    %c0_2 = arith.constant 0 : index
    %c0_3 = arith.constant 0 : index
    %3 = vector.load %arg2[%c0_2, %c0_3] : memref<32x96xf32, #tpu.memory_space<vmem>>, vector<32x96xf32>
    %4 = arith.truncf %3 : vector<32x96xf32> to vector<32x96xbf16>
    %cst = arith.constant dense<0.000000e+00> : vector<8x96xf32>
    %5 = tpu.matmul %2, %4, %cst {dimension_numbers = #tpu.dot_dimension_numbers<[1], [0], [0], [1], [0, 0, 1, 1], [], []>} : vector<8x32xbf16>, vector<32x96xbf16>, vector<8x96xf32> -> vector<8x96xf32>
    %6 = vector.extract_strided_slice %5 {offsets = [0, 0], sizes = [8, 32], strides = [1, 1]} : vector<8x96xf32> to vector<8x32xf32>
    %cst_4 = arith.constant 0.176776692 : f32
    %7 = vector.broadcast %cst_4 : f32 to vector<8x32xf32>
    %8 = arith.mulf %6, %7 : vector<8x32xf32>
    %9 = arith.truncf %8 : vector<8x32xf32> to vector<8x32xbf16>
    %10 = vector.extract_strided_slice %5 {offsets = [0, 32], sizes = [8, 32], strides = [1, 1]} : vector<8x96xf32> to vector<8x32xf32>
    %11 = arith.truncf %10 : vector<8x32xf32> to vector<8x32xbf16>
    %12 = vector.extract_strided_slice %5 {offsets = [0, 64], sizes = [8, 32], strides = [1, 1]} : vector<8x96xf32> to vector<8x32xf32>
    %13 = arith.truncf %12 : vector<8x32xf32> to vector<8x32xbf16>
    %14 = tpu.iota {dimensions = array<i32: 0>} : vector<8x8xi32>
    %15 = tpu.iota {dimensions = array<i32: 1>} : vector<8x8xi32>
    %16 = arith.cmpi sge, %14, %15 : vector<8x8xi32>
    %17 = vector.extract_strided_slice %9 {offsets = [0, 0], sizes = [8, 8], strides = [1, 1]} : vector<8x32xbf16> to vector<8x8xbf16>
    %18 = vector.extract_strided_slice %11 {offsets = [0, 0], sizes = [8, 8], strides = [1, 1]} : vector<8x32xbf16> to vector<8x8xbf16>
    %19 = vector.extract_strided_slice %13 {offsets = [0, 0], sizes = [8, 8], strides = [1, 1]} : vector<8x32xbf16> to vector<8x8xbf16>
    %cst_5 = arith.constant dense<0.000000e+00> : vector<8x8xf32>
    %20 = tpu.matmul %17, %18, %cst_5 {dimension_numbers = #tpu.dot_dimension_numbers<[1], [1], [0], [0], [0, 0, 1, 0], [], []>} : vector<8x8xbf16>, vector<8x8xbf16>, vector<8x8xf32> -> vector<8x8xf32>
    %cst_6 = arith.constant -1.000000e+30 : f32
    %21 = vector.broadcast %cst_6 : f32 to vector<8x8xf32>
    %22 = arith.select %16, %20, %21 : vector<8x8xi1>, vector<8x8xf32>
    %cst_7 = arith.constant dense<0xFF800000> : vector<8xf32>
    %23 = vector.multi_reduction <maximumf>, %22, %cst_7 [1] : vector<8x8xf32> to vector<8xf32>
    %24 = vector.shape_cast %23 : vector<8xf32> to vector<8x1xf32>
    %25 = vector.broadcast %24 : vector<8x1xf32> to vector<8x8xf32>
    %26 = arith.subf %22, %25 : vector<8x8xf32>
    %27 = math.exp %26 : vector<8x8xf32>
    %cst_8 = arith.constant dense<0.000000e+00> : vector<8xf32>
    %28 = vector.multi_reduction <add>, %27, %cst_8 [1] : vector<8x8xf32> to vector<8xf32>
    %29 = vector.shape_cast %28 : vector<8xf32> to vector<8x1xf32>
    %30 = tpu.reciprocal %29 {approx = true} : vector<8x1xf32> -> vector<8x1xf32>
    %31 = vector.broadcast %30 : vector<8x1xf32> to vector<8x8xf32>
    %32 = arith.mulf %27, %31 : vector<8x8xf32>
    %33 = arith.truncf %32 : vector<8x8xf32> to vector<8x8xbf16>
    %cst_9 = arith.constant dense<0.000000e+00> : vector<8x8xf32>
    %34 = tpu.matmul %33, %19, %cst_9 {dimension_numbers = #tpu.dot_dimension_numbers<[1], [0], [0], [1], [0, 0, 1, 1], [], []>} : vector<8x8xbf16>, vector<8x8xbf16>, vector<8x8xf32> -> vector<8x8xf32>
    %c0_10 = arith.constant 0 : index
    %c0_11 = arith.constant 0 : index
    %35 = vector.load %arg6[%c0_10, %c0_11] : memref<8x32xf32, #tpu.memory_space<vmem>>, vector<8x8xf32>
    tpu.vector_store %arg6[%c0_10, %c0_11], %34 {strides = array<i32>} : memref<8x32xf32, #tpu.memory_space<vmem>>, vector<8x8xf32>,
    %36 = vector.extract_strided_slice %9 {offsets = [0, 8], sizes = [8, 8], strides = [1, 1]} : vector<8x32xbf16> to vector<8x8xbf16>
    %37 = vector.extract_strided_slice %11 {offsets = [0, 8], sizes = [8, 8], strides = [1, 1]} : vector<8x32xbf16> to vector<8x8xbf16>
    %38 = vector.extract_strided_slice %13 {offsets = [0, 8], sizes = [8, 8], strides = [1, 1]} : vector<8x32xbf16> to vector<8x8xbf16>
    %cst_12 = arith.constant dense<0.000000e+00> : vector<8x8xf32>
    %39 = tpu.matmul %36, %37, %cst_12 {dimension_numbers = #tpu.dot_dimension_numbers<[1], [1], [0], [0], [0, 0, 1, 0], [], []>} : vector<8x8xbf16>, vector<8x8xbf16>, vector<8x8xf32> -> vector<8x8xf32>
    %cst_13 = arith.constant -1.000000e+30 : f32
    %40 = vector.broadcast %cst_13 : f32 to vector<8x8xf32>
    %41 = arith.select %16, %39, %40 : vector<8x8xi1>, vector<8x8xf32>
    %cst_14 = arith.constant dense<0xFF800000> : vector<8xf32>
    %42 = vector.multi_reduction <maximumf>, %41, %cst_14 [1] : vector<8x8xf32> to vector<8xf32>
    %43 = vector.shape_cast %42 : vector<8xf32> to vector<8x1xf32>
    %44 = vector.broadcast %43 : vector<8x1xf32> to vector<8x8xf32>
    %45 = arith.subf %41, %44 : vector<8x8xf32>
    %46 = math.exp %45 : vector<8x8xf32>
    %cst_15 = arith.constant dense<0.000000e+00> : vector<8xf32>
    %47 = vector.multi_reduction <add>, %46, %cst_15 [1] : vector<8x8xf32> to vector<8xf32>
    %48 = vector.shape_cast %47 : vector<8xf32> to vector<8x1xf32>
    %49 = tpu.reciprocal %48 {approx = true} : vector<8x1xf32> -> vector<8x1xf32>
    %50 = vector.broadcast %49 : vector<8x1xf32> to vector<8x8xf32>
    %51 = arith.mulf %46, %50 : vector<8x8xf32>
    %52 = arith.truncf %51 : vector<8x8xf32> to vector<8x8xbf16>
    %cst_16 = arith.constant dense<0.000000e+00> : vector<8x8xf32>
    %53 = tpu.matmul %52, %38, %cst_16 {dimension_numbers = #tpu.dot_dimension_numbers<[1], [0], [0], [1], [0, 0, 1, 1], [], []>} : vector<8x8xbf16>, vector<8x8xbf16>, vector<8x8xf32> -> vector<8x8xf32>
    %c0_17 = arith.constant 0 : index
    %c8 = arith.constant 8 : index
    %54 = vector.load %arg6[%c0_17, %c8] : memref<8x32xf32, #tpu.memory_space<vmem>>, vector<8x8xf32>
    tpu.vector_store %arg6[%c0_17, %c8], %53 {strides = array<i32>} : memref<8x32xf32, #tpu.memory_space<vmem>>, vector<8x8xf32>,
    %55 = vector.extract_strided_slice %9 {offsets = [0, 16], sizes = [8, 8], strides = [1, 1]} : vector<8x32xbf16> to vector<8x8xbf16>
    %56 = vector.extract_strided_slice %11 {offsets = [0, 16], sizes = [8, 8], strides = [1, 1]} : vector<8x32xbf16> to vector<8x8xbf16>
    %57 = vector.extract_strided_slice %13 {offsets = [0, 16], sizes = [8, 8], strides = [1, 1]} : vector<8x32xbf16> to vector<8x8xbf16>
    %cst_18 = arith.constant dense<0.000000e+00> : vector<8x8xf32>
    %58 = tpu.matmul %55, %56, %cst_18 {dimension_numbers = #tpu.dot_dimension_numbers<[1], [1], [0], [0], [0, 0, 1, 0], [], []>} : vector<8x8xbf16>, vector<8x8xbf16>, vector<8x8xf32> -> vector<8x8xf32>
    %cst_19 = arith.constant -1.000000e+30 : f32
    %59 = vector.broadcast %cst_19 : f32 to vector<8x8xf32>
    %60 = arith.select %16, %58, %59 : vector<8x8xi1>, vector<8x8xf32>
    %cst_20 = arith.constant dense<0xFF800000> : vector<8xf32>
    %61 = vector.multi_reduction <maximumf>, %60, %cst_20 [1] : vector<8x8xf32> to vector<8xf32>
    %62 = vector.shape_cast %61 : vector<8xf32> to vector<8x1xf32>
    %63 = vector.broadcast %62 : vector<8x1xf32> to vector<8x8xf32>
    %64 = arith.subf %60, %63 : vector<8x8xf32>
    %65 = math.exp %64 : vector<8x8xf32>
    %cst_21 = arith.constant dense<0.000000e+00> : vector<8xf32>
    %66 = vector.multi_reduction <add>, %65, %cst_21 [1] : vector<8x8xf32> to vector<8xf32>
    %67 = vector.shape_cast %66 : vector<8xf32> to vector<8x1xf32>
    %68 = tpu.reciprocal %67 {approx = true} : vector<8x1xf32> -> vector<8x1xf32>
    %69 = vector.broadcast %68 : vector<8x1xf32> to vector<8x8xf32>
    %70 = arith.mulf %65, %69 : vector<8x8xf32>
    %71 = arith.truncf %70 : vector<8x8xf32> to vector<8x8xbf16>
    %cst_22 = arith.constant dense<0.000000e+00> : vector<8x8xf32>
    %72 = tpu.matmul %71, %57, %cst_22 {dimension_numbers = #tpu.dot_dimension_numbers<[1], [0], [0], [1], [0, 0, 1, 1], [], []>} : vector<8x8xbf16>, vector<8x8xbf16>, vector<8x8xf32> -> vector<8x8xf32>
    %c0_23 = arith.constant 0 : index
    %c16 = arith.constant 16 : index
    %73 = vector.load %arg6[%c0_23, %c16] : memref<8x32xf32, #tpu.memory_space<vmem>>, vector<8x8xf32>
    tpu.vector_store %arg6[%c0_23, %c16], %72 {strides = array<i32>} : memref<8x32xf32, #tpu.memory_space<vmem>>, vector<8x8xf32>,
    %74 = vector.extract_strided_slice %9 {offsets = [0, 24], sizes = [8, 8], strides = [1, 1]} : vector<8x32xbf16> to vector<8x8xbf16>
    %75 = vector.extract_strided_slice %11 {offsets = [0, 24], sizes = [8, 8], strides = [1, 1]} : vector<8x32xbf16> to vector<8x8xbf16>
    %76 = vector.extract_strided_slice %13 {offsets = [0, 24], sizes = [8, 8], strides = [1, 1]} : vector<8x32xbf16> to vector<8x8xbf16>
    %cst_24 = arith.constant dense<0.000000e+00> : vector<8x8xf32>
    %77 = tpu.matmul %74, %75, %cst_24 {dimension_numbers = #tpu.dot_dimension_numbers<[1], [1], [0], [0], [0, 0, 1, 0], [], []>} : vector<8x8xbf16>, vector<8x8xbf16>, vector<8x8xf32> -> vector<8x8xf32>
    %cst_25 = arith.constant -1.000000e+30 : f32
    %78 = vector.broadcast %cst_25 : f32 to vector<8x8xf32>
    %79 = arith.select %16, %77, %78 : vector<8x8xi1>, vector<8x8xf32>
    %cst_26 = arith.constant dense<0xFF800000> : vector<8xf32>
    %80 = vector.multi_reduction <maximumf>, %79, %cst_26 [1] : vector<8x8xf32> to vector<8xf32>
    %81 = vector.shape_cast %80 : vector<8xf32> to vector<8x1xf32>
    %82 = vector.broadcast %81 : vector<8x1xf32> to vector<8x8xf32>
    %83 = arith.subf %79, %82 : vector<8x8xf32>
    %84 = math.exp %83 : vector<8x8xf32>
    %cst_27 = arith.constant dense<0.000000e+00> : vector<8xf32>
    %85 = vector.multi_reduction <add>, %84, %cst_27 [1] : vector<8x8xf32> to vector<8xf32>
    %86 = vector.shape_cast %85 : vector<8xf32> to vector<8x1xf32>
    %87 = tpu.reciprocal %86 {approx = true} : vector<8x1xf32> -> vector<8x1xf32>
    %88 = vector.broadcast %87 : vector<8x1xf32> to vector<8x8xf32>
    %89 = arith.mulf %84, %88 : vector<8x8xf32>
    %90 = arith.truncf %89 : vector<8x8xf32> to vector<8x8xbf16>
    %cst_28 = arith.constant dense<0.000000e+00> : vector<8x8xf32>
    %91 = tpu.matmul %90, %76, %cst_28 {dimension_numbers = #tpu.dot_dimension_numbers<[1], [0], [0], [1], [0, 0, 1, 1], [], []>} : vector<8x8xbf16>, vector<8x8xbf16>, vector<8x8xf32> -> vector<8x8xf32>
    %c0_29 = arith.constant 0 : index
    %c24 = arith.constant 24 : index
    %92 = vector.load %arg6[%c0_29, %c24] : memref<8x32xf32, #tpu.memory_space<vmem>>, vector<8x8xf32>
    tpu.vector_store %arg6[%c0_29, %c24], %91 {strides = array<i32>} : memref<8x32xf32, #tpu.memory_space<vmem>>, vector<8x8xf32>,
    %c0_30 = arith.constant 0 : index
    %c0_31 = arith.constant 0 : index
    %93 = vector.load %arg6[%c0_30, %c0_31] : memref<8x32xf32, #tpu.memory_space<vmem>>, vector<8x32xf32>
    %94 = arith.truncf %93 : vector<8x32xf32> to vector<8x32xbf16>
    %c0_32 = arith.constant 0 : index
    %c0_33 = arith.constant 0 : index
    %95 = vector.load %arg3[%c0_32, %c0_33] : memref<32x32xf32, #tpu.memory_space<vmem>>, vector<32x32xf32>
    %96 = arith.truncf %95 : vector<32x32xf32> to vector<32x32xbf16>
    %cst_34 = arith.constant dense<0.000000e+00> : vector<8x32xf32>
    %97 = tpu.matmul %94, %96, %cst_34 {dimension_numbers = #tpu.dot_dimension_numbers<[1], [0], [0], [1], [0, 0, 1, 1], [], []>} : vector<8x32xbf16>, vector<32x32xbf16>, vector<8x32xf32> -> vector<8x32xf32>
    %c0_35 = arith.constant 0 : index
    %c0_36 = arith.constant 0 : index
    %98 = vector.load %arg4[%c0_35, %c0_36] : memref<1x32xf32, #tpu.memory_space<vmem>>, vector<1x32xf32>
    %99 = vector.broadcast %98 : vector<1x32xf32> to vector<8x32xf32>
    %100 = arith.addf %97, %99 : vector<8x32xf32>
    %c0_37 = arith.constant 0 : index
    %c0_38 = arith.constant 0 : index
    %c0_39 = arith.constant 0 : index
    %101 = vector.load %arg5[%c0_37, %c0_38, %c0_39] : memref<1x8x32xf32, #tpu.memory_space<vmem>>, vector<1x8x32xf32>
    %102 = vector.shape_cast %101 : vector<1x8x32xf32> to vector<8x32xf32>
    %103 = vector.shape_cast %100 : vector<8x32xf32> to vector<1x8x32xf32>
    tpu.vector_store %arg5[%c0_37, %c0_38, %c0_39], %103 {strides = array<i32>} : memref<1x8x32xf32, #tpu.memory_space<vmem>>, vector<1x8x32xf32>,
    return
  }
  func.func @transform_0(%arg0: i32) -> (i32, i32, i32) {
    %c0_i32 = arith.constant 0 : i32
    %c0_i32_0 = arith.constant 0 : i32
    %c0_i32_1 = arith.constant 0 : i32
    return %arg0, %c0_i32, %c0_i32_0 : i32, i32, i32
  }
  func.func @transform_1(%arg0: i32) -> (i32, i32) {
    %c0_i32 = arith.constant 0 : i32
    %c0_i32_0 = arith.constant 0 : i32
    %c0_i32_1 = arith.constant 0 : i32
    return %c0_i32, %c0_i32_0 : i32, i32
  }
  func.func @transform_2(%arg0: i32) -> (i32, i32) {
    %c0_i32 = arith.constant 0 : i32
    %c0_i32_0 = arith.constant 0 : i32
    %c0_i32_1 = arith.constant 0 : i32
    return %c0_i32, %c0_i32_0 : i32, i32
  }
  func.func @transform_3(%arg0: i32) -> (i32, i32) {
    %c0_i32 = arith.constant 0 : i32
    %c0_i32_0 = arith.constant 0 : i32
    %c0_i32_1 = arith.constant 0 : i32
    return %c0_i32, %c0_i32_0 : i32, i32
  }
  func.func @transform_4(%arg0: i32) -> (i32, i32, i32) {
    %c0_i32 = arith.constant 0 : i32
    %c0_i32_0 = arith.constant 0 : i32
    %c0_i32_1 = arith.constant 0 : i32
    return %arg0, %c0_i32, %c0_i32_0 : i32, i32, i32
  }
}

</mosaic_0001>

<bundles_post_ra>
// kernel: tpu_custom_call.1
= control target key start
LH: loop header
LB: loop body
LE: loop exit
PB: predicated region body
PF: predicated region fallthrough
CT: control target
= control target key end

     0   :  { %9 = vsyncpa [#allocation4], 0  ;;  %s1659_s0 = inlined_call_operand.hbm [shape: f32[2,8,32], index: 0, kind: input, shape index: {}]   ;;  %s1660_s1 = inlined_call_operand.hbm [shape: f32[32,96], index: 1, kind: input, shape index: {}]   ;;  %s1661_s2 = inlined_call_operand.hbm [shape: f32[32,32], index: 2, kind: input, shape index: {}]   ;;  %s1662_s3 = inlined_call_operand.vmem [shape: f32[1,32], index: 3, kind: input, shape index: {}]   ;;  %s1663_s4 = inlined_call_operand.hbm [shape: f32[2,8,32], index: 4, kind: output, shape index: {}]  }
   0x1   :  { %11 = vsyncpa [#allocation4 + $0x1], 0 }
   0x2   :  { %12 = vsyncpa [#allocation7], 0 }
   0x3   :  { %13 = vsyncpa [#allocation5], 0 }
   0x4   :  { %15 = vsyncpa [#allocation5 + $0x1], 0  ;;  %s1349_s15 = smov 0   ;;  %s1351_s16 = smov 0  }
   0x5   :  { %s1353_s17 = smov 0   ;;  %s1355_s18 = smov 0  }
   0x6 LB: > { %s1370_s19 = sadd.s32 4294967295, %s1300_s18   ;;  %s930_s20 = sadd.s32 4294967294, %s1300_s18   ;;  %s1300_s18 = sphi %s1355_s18, %s1683_s18   ;;  %s1296_s17 = sphi %s1353_s17, %s1682_s17   ;;  %s1292_s16 = sphi %s1351_s16, %s1681_s16   ;;  %s1288_s15 = sphi %s1349_s15, %s1680_s15  }
   0x7   : > { %p41_p0 = scmp.ne.s32.totalorder %s1292_s16, %s1288_s15  ;;  %p1664_p1 = scmp.eq.s32.totalorder %s1370_s19, 0 }
   0x8   : > { %p134_p3 = scmp.eq.s32.totalorder %s930_s20, 1  ;;  %p931_p5 = scmp.ge.s32.totalorder %s1300_s18, 1 }
   0x9   : > { %p1379_p4 = por %p1664_p1, %p41_p0  ;;  %p141_p7 = scmp.lt.s32.totalorder %s1300_s18, 3 }
   0xa   : > { %p1384_p6 = por %p134_p3, %p41_p0  ;;  %s1302_s24 = smov [#allocation6]  }
   0xb   : > { %s1667_s21 = scalar_select %p1379_p4, 1, 0 }
   0xc   : > { %s1668_s22 = scalar_select %p1384_p6, 1, 0 }
   0xd   : > { %p1389_p8 = pnand %p931_p5, %p141_p7  ;;  %s153_s25 = sshll.u32 %s1302_s24, 4  ;;  %s1393_s25 = int_to_ptr.vmem [resolvable:$true] %s153_s25 }
   0xe   : > { %s1303_s27 = smov [#allocation8]   ;;  %s1144_s5 = scalar_lea.hbm %s1660_s1, 512 }
   0xf   : > { %p1055_p9 = pneg %p1389_p8  ;;  %s166_s28 = sshll.u32 %s1303_s27, 4  ;;  %s1404_s28 = int_to_ptr.vmem [resolvable:$true] %s166_s28 }
  0x10   : > { %p1145_p12 = scmp.ne.s32.totalorder %s1660_s1, %s1144_s5  ;;  %p1151_p5 = scmp.lt.u32.totalorder %s1144_s5, %s1660_s1 }
  0x11   : > { %p1400_p11 = pnand %p1055_p9, %p1664_p1 }
  0x13   : > { %p1146_p13 = pneg %p1400_p11 }
  0x15   : > { %p1147_p0 = pnand %p1146_p13, %p1145_p12 }
  0x17   : > { %p1148_p3 = pneg %p1147_p0 }
  0x19   : > { %p1153_p7 = pnand %p1151_p5, %p1148_p3 }
  0x1b   : > { %1156 = shalt.err (!%p1153_p7)
}
  0x1c   : > { %s1157_s10 = scalar_lea.vmem %s1393_s25, 512  ;;  %p1165_p2 = scmp.lt.s32.totalorder %s1393_s25, %s1393_s25 }
  0x1d   : > { %p1158_p9 = scmp.ne.s32.totalorder %s1393_s25, %s1157_s10  ;;  %p1166_p12 = scmp.lt.s32.totalorder %s1157_s10, %s1157_s10 }
  0x1f   : > { %p1160_p10 = pnand %p1158_p9, %p1146_p13  ;;  %p1167_p0 = por %p1166_p12, %p1165_p2 }
  0x21   : > { %p1161_p1 = pneg %p1160_p10 }
  0x23   : > { %p1168_p6 = pnand %p1167_p0, %p1161_p1 }
  0x25   : > { %1171 = shalt.err (!%p1168_p6)
}
  0x26   : > { %s1304_s11 = smov 128   ;;  %s1305_s12 = smov 8  }
  0x27   : > { %1058 = dma.hbm_to_vmem [thread:$0]  (!%p1400_p11), %s1660_s1, 512, %s1393_s25, [#allocation7], %s1304_s11, %s1304_s11, %s1305_s12  }
  0x28   : > { %s1172_s27 = scalar_lea.hbm %s1661_s2, 512 }
  0x29   : > { %p1173_p2 = scmp.ne.s32.totalorder %s1661_s2, %s1172_s27  ;;  %p1179_p10 = scmp.lt.u32.totalorder %s1172_s27, %s1661_s2 }
  0x2b   : > { %p1175_p1 = pnand %p1173_p2, %p1146_p13 }
  0x2d   : > { %p1176_p6 = pneg %p1175_p1 }
  0x2f   : > { %p1181_p3 = pnand %p1179_p10, %p1176_p6 }
  0x31   : > { %1184 = shalt.err (!%p1181_p3)
}
  0x32   : > { %s1185_s25 = scalar_lea.vmem %s1404_s28, 512  ;;  %p1193_p12 = scmp.lt.s32.totalorder %s1404_s28, %s1404_s28 }
  0x33   : > { %p1186_p5 = scmp.ne.s32.totalorder %s1404_s28, %s1185_s25  ;;  %p1194_p0 = scmp.lt.s32.totalorder %s1185_s25, %s1185_s25 }
  0x35   : > { %p1188_p7 = pnand %p1186_p5, %p1146_p13  ;;  %p1195_p2 = por %p1194_p0, %p1193_p12 }
  0x37   : > { %p1189_p9 = pneg %p1188_p7 }
  0x39   : > { %p1196_p1 = pnand %p1195_p2, %p1189_p9 }
  0x3b   : > { %1199 = shalt.err (!%p1196_p1)
}
  0x3c   : > { %1061 = dma.hbm_to_vmem [thread:$0]  (!%p1400_p11), %s1661_s2, 512, %s1404_s28, [#allocation7], %s1304_s11, %s1304_s11, %s1305_s12  }
  0x3d   : > { %s1459_s9 = sadd.s32 1, %s1300_s18   ;;  %s28_s26 = sadd.s32 1, %s1296_s17 }
  0x3e   : > { %s25_s10 = ssub.s32 %s1300_s18, %s1459_s9  ;;  %p35_p13 = scmp.ne.s32.totalorder %s1296_s17, %s1292_s16 }
  0x3f   : > { %p26_p6 = scmp.eq.s32.totalorder %s25_s10, 0  ;;  %p36_p10 = scmp.eq.s32.totalorder %s1300_s18, 0 }
  0x40   : > { %p1671_p3 = scmp.eq.s32.totalorder %s1370_s19, 1  ;;  %p1072_p7 = scmp.lt.s32.totalorder %s1300_s18, 2 }
  0x41   : > { %s1475_s14 = scalar_select %p26_p6, %s1296_s17, %s28_s26  }
  0x42   : > { %p1469_p5 = por %p1671_p3, %p35_p13  ;;  %p37_p9 = por %p36_p10, %p35_p13 }
  0x43   : > { %s183_s20 = sand.u32 1, %s1296_s17   ;;  %s936_s28 = sshll.u32 %s1300_s18, 7 }
  0x44   : > { %s1672_s13 = scalar_select %p1469_p5, 1, 0 }
  0x45   : > { %s935_s24 = sshll.u32 %s183_s20, 3  ;;  %s1482_s27 = scalar_lea.hbm %s1659_s0, %s936_s28 }
  0x46   : > { %s187_s29 = scalar_lea.vmem [#allocation3], %s935_s24  ;;  %p1486_p11 = pnand %p1072_p7, %p37_p9 }
  0x47   : > { %s194_s30 = sshll.u32 %s187_s29, 4  ;;  %s184_s6 = scalar_lea.sflag [#allocation4], %s183_s20  ;;  %s1484_s30 = int_to_ptr.vmem [resolvable:$true] %s194_s30 }
  0x48   : > { %s1200_s25 = scalar_lea.hbm %s1482_s27, 128  ;;  %p1202_p0 = pneg %p1486_p11 }
  0x49   : > { %p1201_p12 = scmp.ne.s32.totalorder %s1482_s27, %s1200_s25  ;;  %s1205_s26 = scalar_lea.hbm %s1659_s0, 256 }
  0x4a   : > { %p1206_p13 = scmp.lt.u32.totalorder %s1482_s27, %s1659_s0  ;;  %p1207_p6 = scmp.lt.u32.totalorder %s1205_s26, %s1200_s25 }
  0x4b   : > { %p1203_p2 = pnand %p1202_p0, %p1201_p12  ;;  %p1209_p3 = scmp.lt.u32.totalorder %s1200_s25, %s1482_s27 }
  0x4c   : > { %p1208_p10 = por %p1207_p6, %p1206_p13 }
  0x4d   : > { %p1204_p1 = pneg %p1203_p2 }
  0x4e   : > { %p1210_p7 = por %p1209_p3, %p1208_p10 }
  0x50   : > { %p1211_p9 = pnand %p1210_p7, %p1204_p1 }
  0x52   : > { %1214 = shalt.err (!%p1211_p9)
}
  0x53   : > { %s1215_s20 = scalar_lea.vmem %s1484_s30, 128  ;;  %s1306_s28 = smov [#allocation3]  }
  0x54   : > { %p1216_p12 = scmp.ne.s32.totalorder %s1484_s30, %s1215_s20  ;;  %s1220_s11 = sshll.u32 %s1306_s28, 4  ;;  %s1221_s11 = int_to_ptr.vmem [resolvable:$false] %s1220_s11 }
  0x55   : > { %s1222_s12 = scalar_lea.vmem %s1221_s11, 256  ;;  %p1223_p4 = scmp.lt.s32.totalorder %s1484_s30, %s1221_s11 }
  0x56   : > { %p1218_p2 = pnand %p1216_p12, %p1202_p0  ;;  %p1224_p13 = scmp.lt.s32.totalorder %s1222_s12, %s1215_s20 }
  0x58   : > { %p1219_p5 = pneg %p1218_p2  ;;  %p1225_p6 = por %p1224_p13, %p1223_p4 }
  0x5a   : > { %p1226_p10 = pnand %p1225_p6, %p1219_p5 }
  0x5c   : > { %1229 = shalt.err (!%p1226_p10)
}
  0x5d   : > { %1065 = dma.hbm_to_vmem [thread:$0]  (!%p1486_p11), %s1482_s27, 128, %s1484_s30, %s184_s6  }
  0x5e   : > { %203 = sbr.rel (%p1389_p8) target bundleno = 1608 (0x648), region = 36  ;;  %s1518_s29 = sand.u32 (!%p1389_p8), 1, %s1292_s16  }
  0x5f   : > { %s938_s25 = sshll.u32 (!%p1389_p8), %s1518_s29, 3  ;;  %s206_s7 = scalar_lea.sflag (!%p1389_p8), [#allocation4], %s1518_s29 }
  0x60   : > { %s209_s8 = scalar_lea.vmem (!%p1389_p8), [#allocation3], %s938_s25  ;;  %p1674_p4 = scmp.ne.s32.totalorder (!%p1389_p8), %s1667_s21, 0 }
  0x65   : > { %1275 = dma.done.wait (%p1674_p4), %s206_s7, 128  }
  0x66   : > { %1277 = vsyncadd (%p1674_p4), %s206_s7, 4294967168  ;;  %p1675_p5 = scmp.eq.s32.totalorder %s1370_s19, 0 }
  0x68   : > { %1279 = dma.done.wait (%p1675_p5), [#allocation7], 1024   ;;  %p1676_p8 = pmov %p1675_p5 }
  0x69   : > { %v1307_v0 = vmov 0.0   ;;  %vm1308_vm0 = vmmov 0   ;;  %v245_v1 = vld [vmem:[#allocation6] sm:$0xff]  ;;  %v246_v2 = vld [vmem:[#allocation6 + $0x8] sm:$0xff]  ;;  %v247_v3 = vld [vmem:[#allocation6 + $0x10] sm:$0xff]  ;;  %vm251_vm1 = vcmask 261120   ;;  %v298_v27 = vlaneseq }
  0x6a   : > { %1281 = vsyncadd (%p1676_p8), [#allocation7], 4294966272  ;;  %979 = vmatprep.subr.bf16.mxu0 %v1307_v0  ;;  %983 = vmatprep.mubr.msk.bf16.mxu0 %vm1308_vm0, %v1307_v0  ;;  %v249_v4 = vpack.c.bf16 %v246_v2, %v245_v1  ;;  %v248_v5 = vld [vmem:[#allocation6 + $0x18] sm:$0xff]  ;;  %s1309_s21 = smov 96   ;;  %s1310_s23 = smov 120   ;;  %vm306_vm2 = vcmask 64512  }
  0x6b   : > { %987 = vmatprep.subr.bf16.mxu1 %v1307_v0  ;;  %989 = vmatprep.mubr.msk.bf16.mxu1 %vm1308_vm0, %v1307_v0  ;;  %v250_v6 = vpack.c.bf16 %v248_v5, %v247_v3  ;;  %v243_v7 = vld [vmem:[%s209_s8] sm:$0xff]  ;;  %s1311_s27 = smov 88   ;;  %s1312_s30 = smov 80   ;;  %v299_v28 = vshrl.u32 %v298_v27, 7  ;;  %v301_v29 = vand.u32 127, %v298_v27  ;;  %vm371_vm4 = vcmask 1043456  }
  0x6c   : > { %980 = vmatpush3.bf16.msra.mxu0 %v249_v4  ;;  %v244_v8 = vpack.c.bf16 %v243_v7, %v243_v7  ;;  %s1313_s5 = smov 112   ;;  %s1314_s6 = smov 72   ;;  %vm532_vm5 = vcmask 130112   ;;  %vm649_vm6 = vcmask 195712   ;;  %vm766_vm7 = vcmask 261312  }
  0x6d   : > { %981 = vmatprep.subr.bf16.mxu0 %v1307_v0  ;;  %s1315_s26 = smov 104   ;;  %vm302_vm3 = vcmp.ge.s32.totalorder %v299_v28, %v301_v29  ;;  %s1316_s10 = smov 56  }
  0x6e   : > { %s1317_s24 = smov 64   ;;  %s1318_s20 = smov 40  }
  0x6f   : > { %s1319_s28 = smov 48   ;;  %s1320_s11 = smov 8  }
  0x70   : > { %982 = vmatpush3.bf16.msra.mxu0 %v250_v6  ;;  %s1321_s12 = smov 16   ;;  %s1322_s7 = smov 24  }
  0x71   : > { %993 = vmatprep.subr.bf16.mxu0 %v1307_v0  ;;  %p1677_p0 = scmp.ne.s32.totalorder %s1672_s13, 0 }
  0x73   : > { %984 = vmatmul.mubr.msk.bf16.vlgmr.msra.gmra.mrb[0].mxu0 %vm251_vm1, %v244_v8 }
  0x74   : > { %995 = vmatprep.mubr.msk.bf16.mxu0 %vm1308_vm0, %v1307_v0 }
 0x146   : > { %v289_v9 = vpop.f32.mrb[0].mxu0 }
 0x147   : > { %v295_v10 = vmul.f32 0.17677669, %v289_v9  ;;  %v1543_v11 = vpack.c.bf16 %v289_v9, %v289_v9  ;;  %v985_v12 = vpop.f32.mrb[1].mxu0 }
 0x148   : > { %v292_v13 = vpop.f32.mrb[2].mxu0 }
 0x149   : > { %v296_v14 = vpack.c.bf16 %v295_v10, %v295_v10  ;;  %304 = vrot.lane.b32.xlu0 %v1543_v11, %s1309_s21  ;;  %v986_v15 = vpop.f32.mrb[3].mxu0 }
 0x14b   : > { %417 = vrot.lane.b32.xlu1 %v296_v14, %s1310_s23  ;;  %s954_s23 = sshll.u32 %s1370_s19, 7  ;;  %s828_s19 = scalar_lea.sflag [#allocation5], %s1518_s29 }
 0x14d   : > { %419 = vrot.lane.b32.xlu0 %v1543_v11, %s1311_s27  ;;  %s241_s27 = scalar_lea.vmem [#allocation9], %s938_s25 }
 0x14f   : > { %536 = vrot.lane.b32.xlu1 %v1543_v11, %s1312_s30  ;;  %s841_s30 = sshll.u32 %s241_s27, 4  ;;  %s1616_s30 = int_to_ptr.vmem [resolvable:$true] %s841_s30 }
 0x150   : > { %s1230_s25 = scalar_lea.vmem %s1616_s30, 128 }
 0x151   : > { %534 = vrot.lane.b32.xlu0 %v296_v14, %s1313_s5  ;;  %p1231_p11 = scmp.ne.s32.totalorder %s1616_s30, %s1230_s25 }
 0x153   : > { %653 = vrot.lane.b32.xlu1 %v1543_v11, %s1314_s6  ;;  %p1232_p1 = pnand %p1231_p11, %p1677_p0 }
 0x155   : > { %651 = vrot.lane.b32.xlu0 %v296_v14, %s1315_s26  ;;  %s1614_s26 = scalar_lea.hbm %s1663_s4, %s954_s23  ;;  %p1233_p3 = pneg %p1232_p1 }
 0x1bb   : > { %v305_v16 = vpop.permute.xlu0 %304 }
 0x1bc   : > { %v311_v17 = vsel %vm306_vm2, %v305_v16, 0 }
 0x1bd   : > { %988 = vmatpush3.bf16.xpose.msra.mxu1 %v311_v17  ;;  %v418_v19 = vpop.permute.xlu1 %417 }
 0x1be   : > { %999 = vmatprep.subr.bf16.mxu1 %v1307_v0 }
 0x1bf   : > { %v420_v18 = vpop.permute.xlu0 %419 }
 0x1c0   : > { %v425_v20 = vsel %vm306_vm2, %v420_v18, 0 }
 0x1c1   : > { %v537_v21 = vpop.permute.xlu1 %536 }
 0x1c2   : > { %v542_v22 = vsel %vm306_vm2, %v537_v21, 0 }
 0x1c3   : > { %v535_v24 = vpop.permute.xlu0 %534 }
 0x1c4   : > { %990 = vmatmul.mubr.msk.bf16.vlgmr.msra.gmra.mrb[0].mxu1 %vm306_vm2, %v296_v14 }
 0x1c5   : > { %1000 = vmatpush3.bf16.xpose.msra.mxu1 %v425_v20  ;;  %1001 = vmatprep.mubr.msk.bf16.mxu1 %vm1308_vm0, %v1307_v0  ;;  %v654_v23 = vpop.permute.xlu1 %653 }
 0x1c6   : > { %1011 = vmatprep.subr.bf16.mxu1 %v1307_v0  ;;  %v659_v25 = vsel %vm306_vm2, %v654_v23, 0 }
 0x1c7   : > { %v652_v26 = vpop.permute.xlu0 %651 }
 0x1cc   : > { %1002 = vmatmul.mubr.msk.bf16.vlgmr.msra.gmra.mrb[4].mxu1 %vm306_vm2, %v418_v19 }
 0x1cd   : > { %1012 = vmatpush3.bf16.xpose.msra.mxu1 %v542_v22  ;;  %1013 = vmatprep.mubr.msk.bf16.mxu1 %vm1308_vm0, %v1307_v0 }
 0x1ce   : > { %1023 = vmatprep.subr.bf16.mxu1 %v1307_v0 }
 0x1d4   : > { %1014 = vmatmul.mubr.msk.bf16.vlgmr.msra.gmra.mrb[8].mxu1 %vm306_vm2, %v535_v24 }
 0x1d5   : > { %1024 = vmatpush3.bf16.xpose.msra.mxu1 %v659_v25  ;;  %1025 = vmatprep.mubr.msk.bf16.mxu1 %vm1308_vm0, %v1307_v0 }
 0x1d6   : > { %1035 = vmatprep.subr.bf16.mxu1 %v1307_v0 }
 0x1dc   : > { %1026 = vmatmul.mubr.msk.bf16.vlgmr.msra.gmra.mrb[12].mxu1 %vm306_vm2, %v652_v26 }
 0x1dd   : > { %1039 = vmatprep.mubr.msk.bf16.mxu1 %vm1308_vm0, %v1307_v0 }
 0x297   : > { %v347_v30 = vpop.f32.mrb[0].mxu1 }
 0x298   : > { %v353_v31 = vsel %vm302_vm3, %v347_v30, -1e+30  ;;  %v991_v32 = vpop.f32.mrb[1].mxu1 }
 0x299   : > { %v350_v33 = vpop.f32.mrb[2].mxu1  ;;  %v354_v34 = vsel %vm306_vm2, %v353_v31, -inf }
 0x29a   : > { %355 = vmax.xlane.f32.xlu1 %v354_v34  ;;  %v992_v35 = vpop.f32.mrb[3].mxu1 }
 0x29f   : > { %v461_v36 = vpop.f32.mrb[4].mxu1 }
 0x2a0   : > { %v467_v37 = vsel %vm302_vm3, %v461_v36, -1e+30  ;;  %v1003_v38 = vpop.f32.mrb[5].mxu1 }
 0x2a1   : > { %v464_v39 = vpop.f32.mrb[6].mxu1  ;;  %v468_v40 = vsel %vm306_vm2, %v467_v37, -inf }
 0x2a2   : > { %469 = vmax.xlane.f32.xlu0 %v468_v40  ;;  %v1004_v41 = vpop.f32.mrb[7].mxu1 }
 0x2a7   : > { %v578_v42 = vpop.f32.mrb[8].mxu1 }
 0x2a8   : > { %v584_v43 = vsel %vm302_vm3, %v578_v42, -1e+30  ;;  %v1015_v44 = vpop.f32.mrb[9].mxu1 }
 0x2a9   : > { %v581_v45 = vpop.f32.mrb[10].mxu1  ;;  %v585_v46 = vsel %vm306_vm2, %v584_v43, -inf  ;;  %v771_v44 = vld [vmem:[#allocation8 + $0x8] sm:$0xff] }
 0x2aa   : > { %586 = vmax.xlane.f32.xlu0 %v585_v46  ;;  %v1016_v47 = vpop.f32.mrb[11].mxu1  ;;  %v772_v45 = vld [vmem:[#allocation8 + $0x10] sm:$0xff] }
 0x2ab   : > { %v773_v47 = vld [vmem:[#allocation8 + $0x18] sm:$0xff] }
 0x2af   : > { %v695_v48 = vpop.f32.mrb[12].mxu1 }
 0x2b0   : > { %v701_v49 = vsel %vm302_vm3, %v695_v48, -1e+30  ;;  %v1027_v50 = vpop.f32.mrb[13].mxu1  ;;  %v775_v48 = vpack.c.bf16 %v773_v47, %v772_v45 }
 0x2b1   : > { %v698_v51 = vpop.f32.mrb[14].mxu1  ;;  %v702_v52 = vsel %vm306_vm2, %v701_v49, -inf }
 0x2b2   : > { %703 = vmax.xlane.f32.xlu1 %v702_v52  ;;  %v1028_v53 = vpop.f32.mrb[15].mxu1 }
 0x327   : > { %v356_v54 = vpop.xlane.xlu1 %355 }
 0x328   : > { %v357_v55 = vsub.f32 %v353_v31, %v356_v54 }
 0x32a   : > { %v358_v56 = vmul.f32 1.442695, %v357_v55 }
 0x32c   : > { %1128 = vpow2.f32 %v358_v56 }
 0x32f   : > { %v470_v57 = vpop.xlane.xlu0 %469 }
 0x330   : > { %v471_v58 = vsub.f32 %v467_v37, %v470_v57 }
 0x332   : > { %v472_v59 = vmul.f32 1.442695, %v471_v58 }
 0x334   : > { %1130 = vpow2.f32 %v472_v59 }
 0x336   : > { %v1129_v60 = vpop.eup %1128 }
 0x337   : > { %v587_v61 = vpop.xlane.xlu0 %586  ;;  %v360_v62 = vsel %vm306_vm2, %v1129_v60, 0.0 }
 0x338   : > { %v588_v63 = vsub.f32 %v584_v43, %v587_v61  ;;  %361 = vadd.xlane.f32.xlu0 %v360_v62  ;;  %v770_v43 = vld [vmem:[#allocation8] sm:$0xff]  ;;  %v951_v61 = vld [vmem:[%s1662_s3] ss:$0 sm:$0xff] }
 0x339   : > { %v774_v46 = vpack.c.bf16 %v771_v44, %v770_v43 }
 0x33a   : > { %v589_v1 = vmul.f32 1.442695, %v588_v63 }
 0x33b   : > { %1036 = vmatpush3.bf16.msra.mxu1 %v774_v46 }
 0x33c   : > { %1132 = vpow2.f32 %v589_v1  ;;  %1037 = vmatprep.subr.bf16.mxu1 %v1307_v0 }
 0x33e   : > { %v1131_v2 = vpop.eup %1130 }
 0x33f   : > { %v474_v3 = vsel %vm306_vm2, %v1131_v2, 0.0  ;;  %v704_v6 = vpop.xlane.xlu1 %703  ;;  %1038 = vmatpush3.bf16.msra.mxu1 %v775_v48 }
 0x340   : > { %475 = vadd.xlane.f32.xlu1 %v474_v3  ;;  %v705_v7 = vsub.f32 %v701_v49, %v704_v6 }
 0x342   : > { %v706_v8 = vmul.f32 1.442695, %v705_v7 }
 0x344   : > { %1134 = vpow2.f32 %v706_v8 }
 0x346   : > { %v1133_v4 = vpop.eup %1132 }
 0x347   : > { %v591_v5 = vsel %vm306_vm2, %v1133_v4, 0.0 }
 0x348   : > { %592 = vadd.xlane.f32.xlu0 %v591_v5 }
 0x34e   : > { %v1135_v9 = vpop.eup %1134 }
 0x34f   : > { %v708_v10 = vsel %vm306_vm2, %v1135_v9, 0.0 }
 0x351   : > { %480 = vrot.lane.b32.xlu1 %v1543_v11, %s1316_s10  ;;  %s1323_s10 = smov [#allocation9]  }
 0x35e   : > { %366 = vrot.lane.b32.xlu0 %v1543_v11, %s1317_s24  ;;  %s1234_s24 = sshll.u32 %s1323_s10, 4  ;;  %s1235_s24 = int_to_ptr.vmem [resolvable:$false] %s1234_s24 }
 0x35f   : > { %p1237_p7 = scmp.lt.s32.totalorder %s1616_s30, %s1235_s24 }
 0x362   : > { %714 = vrot.lane.b32.xlu0 %v1543_v11, %s1318_s20  ;;  %s1236_s20 = scalar_lea.vmem %s1235_s24, 256 }
 0x363   : > { %p1238_p9 = scmp.lt.s32.totalorder %s1236_s20, %s1230_s25 }
 0x365   : > { %p1239_p12 = por %p1238_p9, %p1237_p7 }
 0x367   : > { %p1240_p2 = pnand %p1239_p12, %p1233_p3 }
 0x375   : > { %709 = vadd.xlane.f32.xlu1 %v708_v10 }
 0x386   : > { %597 = vrot.lane.b32.xlu1 %v1543_v11, %s1319_s28 }
 0x3c5   : > { %v362_v12 = vpop.xlane.xlu0 %361 }
 0x3c6   : > { %1136 = vrcp.f32 %v362_v12 }
 0x3cd   : > { %v476_v13 = vpop.xlane.xlu1 %475 }
 0x3ce   : > { %1138 = vrcp.f32 %v476_v13 }
 0x3d0   : > { %v1137_v14 = vpop.eup %1136 }
 0x3d1   : > { %v364_v16 = vmul.f32 %v1137_v14, %v1129_v60  ;;  %v481_v19 = vpop.permute.xlu1 %480 }
 0x3d2   : > { %v486_v22 = vsel %vm371_vm4, %v481_v19, 0 }
 0x3d3   : > { %v365_v20 = vpack.c.bf16 %v364_v16, %v364_v16 }
 0x3d5   : > { %v593_v15 = vpop.xlane.xlu0 %592 }
 0x3d6   : > { %1140 = vrcp.f32 %v593_v15 }
 0x3d8   : > { %v1139_v21 = vpop.eup %1138 }
 0x3d9   : > { %v367_v17 = vpop.permute.xlu0 %366  ;;  %v478_v11 = vmul.f32 %v1139_v21, %v1131_v2 }
 0x3da   : > { %v373_v18 = vsel %vm371_vm4, %v367_v17, 0 }
 0x3db   : > { %994 = vmatpush3.bf16.msra.mxu0 %v373_v18  ;;  %v479_v23 = vpack.c.bf16 %v478_v11, %v478_v11 }
 0x3dc   : > { %1005 = vmatprep.subr.bf16.mxu0 %v1307_v0 }
 0x3dd   : > { %v715_v29 = vpop.permute.xlu0 %714 }
 0x3de   : > { %996 = vmatmul.mubr.msk.bf16.vlgmr.msra.gmra.mrb[4].mxu0 %vm306_vm2, %v365_v20  ;;  %v720_v31 = vsel %vm371_vm4, %v715_v29, 0 }
 0x3df   : > { %1006 = vmatpush3.bf16.msra.mxu0 %v486_v22  ;;  %1007 = vmatprep.mubr.msk.bf16.mxu0 %vm1308_vm0, %v1307_v0 }
 0x3e0   : > { %1017 = vmatprep.subr.bf16.mxu0 %v1307_v0  ;;  %v1141_v24 = vpop.eup %1140 }
 0x3e1   : > { %v595_v26 = vmul.f32 %v1141_v24, %v1133_v4 }
 0x3e3   : > { %v596_v30 = vpack.c.bf16 %v595_v26, %v595_v26 }
 0x3e6   : > { %1008 = vmatmul.mubr.msk.bf16.vlgmr.msra.gmra.mrb[8].mxu0 %vm306_vm2, %v479_v23 }
 0x3e7   : > { %1019 = vmatprep.mubr.msk.bf16.mxu0 %vm1308_vm0, %v1307_v0 }
 0x402   : > { %v710_v25 = vpop.xlane.xlu1 %709 }
 0x403   : > { %1142 = vrcp.f32 %v710_v25 }
 0x406   : > { %v598_v27 = vpop.permute.xlu1 %597 }
 0x407   : > { %v603_v28 = vsel %vm371_vm4, %v598_v27, 0 }
 0x408   : > { %1018 = vmatpush3.bf16.msra.mxu0 %v603_v28 }
 0x409   : > { %1029 = vmatprep.subr.bf16.mxu0 %v1307_v0 }
 0x40b   : > { %1020 = vmatmul.mubr.msk.bf16.vlgmr.msra.gmra.mrb[12].mxu0 %vm306_vm2, %v596_v30 }
 0x40c   : > { %1030 = vmatpush3.bf16.msra.mxu0 %v720_v31  ;;  %1031 = vmatprep.mubr.msk.bf16.mxu0 %vm1308_vm0, %v1307_v0 }
 0x40d   : > { %v1143_v32 = vpop.eup %1142 }
 0x40e   : > { %v712_v33 = vmul.f32 %v1143_v32, %v1135_v9 }
 0x410   : > { %v713_v34 = vpack.c.bf16 %v712_v33, %v712_v33 }
 0x413   : > { %1032 = vmatmul.mubr.msk.bf16.vlgmr.msra.gmra.mrb[16].mxu0 %vm306_vm2, %v713_v34 }
 0x4b1   : > { %v409_v35 = vpop.f32.mrb[4].mxu0 }
 0x4b2   : > { %415 = vst.msk [vmem:[#allocation2] sm:$0xff] %vm306_vm2, %v409_v35  ;;  %v997_v36 = vpop.f32.mrb[5].mxu0 }
 0x4b3   : > { %v412_v37 = vpop.f32.mrb[6].mxu0 }
 0x4b4   : > { %v998_v38 = vpop.f32.mrb[7].mxu0 }
 0x4b9   : > { %v522_v39 = vpop.f32.mrb[8].mxu0 }
 0x4ba   : > { %529 = vrot.lane.b32.xlu1 %v522_v39, %s1320_s11  ;;  %v1009_v40 = vpop.f32.mrb[9].mxu0 }
 0x4bb   : > { %v525_v41 = vpop.f32.mrb[10].mxu0 }
 0x4bc   : > { %v1010_v42 = vpop.f32.mrb[11].mxu0 }
 0x4de   : > { %v639_v49 = vpop.f32.mrb[12].mxu0 }
 0x4df   : > { %646 = vrot.lane.b32.xlu0 %v639_v49, %s1321_s12  ;;  %v1021_v50 = vpop.f32.mrb[13].mxu0 }
 0x4e0   : > { %v642_v51 = vpop.f32.mrb[14].mxu0 }
 0x4e1   : > { %v1022_v52 = vpop.f32.mrb[15].mxu0 }
 0x4e6   : > { %v756_v53 = vpop.f32.mrb[16].mxu0 }
 0x4e7   : > { %763 = vrot.lane.b32.xlu1 %v756_v53, %s1322_s7  ;;  %v1033_v54 = vpop.f32.mrb[17].mxu0 }
 0x4e8   : > { %v759_v55 = vpop.f32.mrb[18].mxu0 }
 0x4e9   : > { %v1034_v56 = vpop.f32.mrb[19].mxu0 }
 0x52c   : > { %v530_v57 = vpop.permute.xlu1 %529 }
 0x52d   : > { %533 = vst.msk [vmem:[#allocation2] sm:$0xff] %vm532_vm5, %v530_v57 }
 0x551   : > { %v647_v58 = vpop.permute.xlu0 %646 }
 0x552   : > { %650 = vst.msk [vmem:[#allocation2] sm:$0xff] %vm649_vm6, %v647_v58 }
 0x559   : > { %v764_v0 = vpop.permute.xlu1 %763 }
 0x55a   : > { %767 = vst.msk [vmem:[#allocation2] sm:$0xff] %vm766_vm7, %v764_v0 }
 0x561   : > { %v768_v59 = vld [vmem:[#allocation2] sm:$0xff] }
 0x562   : > { %v769_v60 = vpack.c.bf16 %v768_v59, %v768_v59 }
 0x564   : > { %1040 = vmatmul.mubr.msk.bf16.vlgmr.msra.gmra.mrb[16].mxu1 %vm251_vm1, %v769_v60 }
 0x637   : > { %v820_v62 = vpop.f32.mrb[16].mxu1 }
 0x638   : > { %v821_v63 = vadd.f32 %v951_v61, %v820_v62  ;;  %v1041_v1 = vpop.f32.mrb[17].mxu1 }
 0x639   : > { %v823_v2 = vpop.f32.mrb[18].mxu1 }
 0x63a   : > { %v1042_v3 = vpop.f32.mrb[19].mxu1  ;;  %826 = vst.msk [vmem:[%s241_s27] sm:$0xff] %vm251_vm1, %v821_v63 }
 0x63b   : > { %1243 = shalt.err (!%p1240_p2)
}
 0x63c   : > { %s1244_s29 = scalar_lea.hbm %s1614_s26, 128  ;;  %s1248_s12 = scalar_lea.hbm %s1663_s4, 256 }
 0x63d   : > { %p1245_p13 = scmp.ne.s32.totalorder %s1614_s26, %s1244_s29  ;;  %p1249_p4 = scmp.lt.u32.totalorder %s1614_s26, %s1663_s4 }
 0x63e   : > { %p1250_p5 = scmp.lt.u32.totalorder %s1248_s12, %s1244_s29  ;;  %p1252_p11 = scmp.lt.u32.totalorder %s1244_s29, %s1614_s26 }
 0x63f   : > { %p1246_p6 = pnand %p1245_p13, %p1677_p0 }
 0x640   : > { %p1251_p8 = por %p1250_p5, %p1249_p4 }
 0x641   : > { %p1247_p10 = pneg %p1246_p6 }
 0x642   : > { %p1253_p1 = por %p1252_p11, %p1251_p8 }
 0x644   : > { %p1254_p3 = pnand %p1253_p1, %p1247_p10 }
 0x646   : > { %1257 = shalt.err (!%p1254_p3)
}
 0x647   : > { %1053 = dma.vmem_to_hbm [thread:$0]  (%p1677_p0), %s1616_s30, 128, %s1614_s26, %s828_s19  }
 0x648 PF: > { %s853_s21 = sand.u32 1, %s1288_s15   ;;  %p1678_p7 = scmp.ne.s32.totalorder %s1668_s22, 0 }
 0x649   : > { %p1679_p9 = scmp.ge.s32.totalorder %s1300_s18, 2  ;;  %s854_s23 = scalar_lea.sflag [#allocation5], %s853_s21 }
 0x64b   : > { %p1067_p12 = pnand %p1679_p9, %p1678_p7 }
 0x64d   : > { %1283 = dma.done.wait (!%p1067_p12), %s854_s23, 128  }
 0x64e   : > { %1285 = vsyncadd (!%p1067_p12), %s854_s23, 4294967168  ;;  %p18_p2 = scmp.ge.s32.totalorder %s1459_s9, 4   ;;  %s1680_s15 = smov %s1292_s16 }
 0x64f   : > { %s1681_s16 = smov %s1296_s17  ;;  %s1682_s17 = smov %s1475_s14 }
 0x650   : > { %s1683_s18 = smov %s1459_s9  ;;  %20 = sbr.rel (!%p18_p2) target bundleno = 6 (0x6), region = 89 }
 0x657   :  { %859 = vsyncpa [#allocation4], 1 }
 0x658   :  { %861 = vsyncpa [#allocation4 + $0x1], 1 }
 0x659   :  { %862 = vsyncpa [#allocation7], 1 }
 0x65a   :  { %863 = vsyncpa [#allocation5], 1 }
 0x65b   :  { %865 = vsyncpa [#allocation5 + $0x1], 1 }

</bundles_post_ra>
